<compile_context>
chip_gen: v7x
topology: tpu7x:2x2x1
jax: 0.10.0
libtpu: 0.0.40
codegen_flags: <defaults>
</compile_context>

<pallas_src>
import numpy as np
import jax
import jax.numpy as jnp
from jax.experimental import pallas as pl
from jax.experimental.pallas import tpu as pltpu  # noqa: F401  (TPU backend)

LANE = 128       # lane-dense padding for every feature axis
ROW_TILE = 16    # bf16 sublane tile -> node counts padded to multiples of 16


def _round_up(n, m):
    return (n + m - 1) // m * m


def _full_spec(shape):
    # Whole-array block, no grid -> index_map takes no args.
    return pl.BlockSpec(shape, lambda: (0,) * len(shape))


# ------------------------------ fused kernel --------------------------------

def _hybrid_fused_kernel(x_ref, mats_ref, w_ref, b_ref, o_ref):
    """Entire HybridNetwork forward on one VMEM-resident block (7 MXU matmuls)."""
    bf16 = jnp.bfloat16

    def dot(a, b):  # bf16 operands, f32 accumulation on the MXU
        return jnp.dot(a, b, preferred_element_type=jnp.float32)

    bias = b_ref[...]                                   # [4, 128] f32

    # initial_proj (both GNNs at once; block-diagonal weight)
    x = (dot(x_ref[...], w_ref[0:128, :]) + bias[0:1]).astype(bf16)

    # SAGEConv 0 (mean aggr): lin_l(mean_j x_src) + lin_r(x_target), then leaky_relu.
    # TODO(synk): F.dropout(p=0.5) implemented as identity (eval-mode semantics).
    m = dot(mats_ref[0], x).astype(bf16)
    h = dot(jnp.concatenate([m, x], axis=-1), w_ref[128:384, :]) + bias[1:2]
    h = jnp.maximum(h, 0.01 * h).astype(bf16)           # leaky_relu, single VPU max

    # SAGEConv 1 (last layer: no activation)
    m = dot(mats_ref[1], h).astype(bf16)
    h = (dot(jnp.concatenate([m, h], axis=-1), w_ref[384:640, :]) + bias[2:3]).astype(bf16)

    # Fusion head: inverse_idx gather + per-res mean (nan_to_num) folded into the
    # pooling matrix; concat([res_out, pooled]) @ W_out == [h | pooled] @ [W1; W2].
    pooled = dot(mats_ref[2], h).astype(bf16)
    o_ref[...] = dot(jnp.concatenate([h, pooled], axis=-1), w_ref[640:896, :]) + bias[3:4]


# ------------------------------ Pallas wrapper -------------------------------

def hybrid_forward(packed):
    """Per-call path: exactly one pallas_call on 4 pre-packed slabs + a final slice."""
    x, mats, w, b = packed["x"], packed["mats"], packed["w"], packed["b"]
    n = x.shape[0]
    out = pl.pallas_call(
        _hybrid_fused_kernel,
        out_shape=jax.ShapeDtypeStruct((n, LANE), jnp.float32),
        in_specs=[_full_spec(x.shape), _full_spec(mats.shape),
                  _full_spec(w.shape), _full_spec(b.shape)],
        out_specs=_full_spec((n, LANE)),
    )(x, mats, w, b)
    return out[:packed["n_res"], :packed["output_size"]]


# ------------------------------ one-time packing ------------------------------

def pack_hybrid(params, res_x, res_aggs, user_x, user_aggs, pool_gather,
                res_size, user_size, hidden, output_size):
    """Hoisted per-call work: build padded bf16/f32 slabs ONCE at init time."""
    f32, bf16 = jnp.float32, jnp.bfloat16
    (agg_r0, _), (agg_r1, r_n2) = res_aggs
    (agg_u0, _), (agg_u1, _) = user_aggs
    rn0, un0 = res_x.shape[0], user_x.shape[0]
    rpad, upad = _round_up(rn0, ROW_TILE), _round_up(un0, ROW_TILE)
    n = rpad + upad
    fin = res_size + user_size
    h2 = 2 * hidden
    assert fin <= LANE and h2 <= LANE and output_size <= LANE

    # stacked node features: res features in cols [0:res_size], user in [res_size:fin]
    x = jnp.zeros((n, LANE), f32)
    x = x.at[:rn0, :res_size].set(res_x)
    x = x.at[rpad:rpad + un0, res_size:fin].set(user_x)

    # block-diagonal aggregation matrices (res block at (0,0), user block at (rpad,rpad))
    def block_diag(rm, um):
        m = jnp.zeros((n, n), f32)
        m = m.at[:rm.shape[0], :rm.shape[1]].set(rm)
        m = m.at[rpad:rpad + um.shape[0], rpad:rpad + um.shape[1]].set(um)
        return m

    pool = jnp.zeros((n, n), f32)
    pool = pool.at[:pool_gather.shape[0], rpad:rpad + pool_gather.shape[1]].set(pool_gather)
    mats = jnp.stack([block_diag(agg_r0, agg_u0),
                      block_diag(agg_r1, agg_u1),
                      pool]).astype(bf16)

    rp, up = params["res_gnn"], params["user_gnn"]

    def bd_weight(rw, uw, r_off, u_off):
        w = jnp.zeros((LANE, LANE), f32)
        w = w.at[r_off:r_off + rw.shape[0], :hidden].set(rw)
        w = w.at[u_off:u_off + uw.shape[0], hidden:h2].set(uw)
        return w

    # initial_proj: outputs stay in the same (block-partitioned) feature columns
    wp = jnp.zeros((LANE, LANE), f32)
    wp = wp.at[:res_size, :res_size].set(rp["proj_w"])
    wp = wp.at[res_size:fin, res_size:fin].set(up["proj_w"])

    def conv_stack(layer, r_off, u_off):
        r_wl, _, r_wr = rp["convs"][layer]
        u_wl, _, u_wr = up["convs"][layer]
        return jnp.concatenate([bd_weight(r_wl, u_wl, r_off, u_off),
                                bd_weight(r_wr, u_wr, r_off, u_off)], axis=0)

    # head: concat([res_out, pooled]) @ out_w  ==  [h | pooled] @ [W1_pad; W2_pad]
    w_head_res = jnp.zeros((LANE, LANE), f32).at[:hidden, :output_size].set(
        params["out_w"][:hidden])
    w_head_usr = jnp.zeros((LANE, LANE), f32).at[hidden:h2, :output_size].set(
        params["out_w"][hidden:])

    w = jnp.concatenate([
        wp,                           # [  0:128]  initial_proj (block-diag)
        conv_stack(0, 0, res_size),   # [128:384]  layer0 stacked [WL; WR]
        conv_stack(1, 0, hidden),     # [384:640]  layer1 stacked [WL; WR]
        w_head_res, w_head_usr,       # [640:896]  head stacked [W_res; W_pooled]
    ], axis=0).astype(bf16)

    b = jnp.zeros((4, LANE), f32)
    b = b.at[0, :res_size].set(rp["proj_b"][0]).at[0, res_size:fin].set(up["proj_b"][0])
    b = b.at[1, :hidden].set(rp["convs"][0][1][0]).at[1, hidden:h2].set(up["convs"][0][1][0])
    b = b.at[2, :hidden].set(rp["convs"][1][1][0]).at[2, hidden:h2].set(up["convs"][1][1][0])
    b = b.at[3, :output_size].set(params["out_b"][0])

    return {"x": x.astype(bf16), "mats": mats, "w": w, "b": b,
            "n_res": int(r_n2), "output_size": int(output_size)}


# ------------------------------ JAX glue -------------------------------------

def build_mean_agg(edge_index, num_src, num_dst):
    """Dense mean-aggregation matrix A[dst, src] = 1/deg(dst)."""
    src, dst = edge_index
    a = jnp.zeros((num_dst, num_src), jnp.float32).at[dst, src].add(1.0)
    deg = a.sum(axis=1, keepdims=True)
    return a / jnp.maximum(deg, 1.0)


def build_pool_gather_matrix(num_users_per_res, inverse_idx, num_user_nodes):
    """P[r, u] = (1/n_r) * #{j in group r : inverse_idx[j] == u}; empty group -> 0 row."""
    seg = np.repeat(np.arange(len(num_users_per_res)), num_users_per_res)
    p = jnp.zeros((len(num_users_per_res), num_user_nodes), jnp.float32)
    p = p.at[jnp.asarray(seg, jnp.int32), inverse_idx].add(1.0)
    denom = jnp.maximum(jnp.asarray(num_users_per_res, jnp.float32), 1.0)[:, None]
    return p / denom


# ------------------------------ param init -----------------------------------

def init_linear(key, fan_in, fan_out, bias=True):
    kw, kb = jax.random.split(key)
    bound = 1.0 / np.sqrt(fan_in)
    w = jax.random.uniform(kw, (fan_in, fan_out), jnp.float32, -bound, bound)
    b = (jax.random.uniform(kb, (1, fan_out), jnp.float32, -bound, bound)
         if bias else jnp.zeros((1, fan_out), jnp.float32))
    return w, b


def init_gnn(key, in_size, hidden):
    k0, k1, k2, k3, k4 = jax.random.split(key, 5)
    proj_w, proj_b = init_linear(k0, in_size, in_size)
    convs = []
    wl0, bl0 = init_linear(k1, in_size, hidden)
    wr0, _ = init_linear(k2, in_size, hidden, bias=False)
    convs.append((wl0, bl0, wr0))
    wl1, bl1 = init_linear(k3, hidden, hidden)
    wr1, _ = init_linear(k4, hidden, hidden, bias=False)
    convs.append((wl1, bl1, wr1))
    return {"proj_w": proj_w, "proj_b": proj_b, "convs": convs}


# ------------------------------ reference (pure JAX, mirrors bf16 math) ------

def _bf(a):
    return a.astype(jnp.bfloat16)


def _dot(a, b):
    return jnp.dot(a, b, preferred_element_type=jnp.float32)


def _ref_gnn(x, aggs, p):
    x = (_dot(_bf(x), _bf(p["proj_w"])) + p["proj_b"]).astype(jnp.bfloat16)
    for i, (agg, n_dst) in enumerate(aggs):
        wl, bl, wr = p["convs"][i]
        m = _dot(_bf(agg), x).astype(jnp.bfloat16)
        out = _dot(m, _bf(wl)) + bl + _dot(x[:n_dst], _bf(wr))
        if i != len(aggs) - 1:
            out = jnp.maximum(out, 0.01 * out)
        x = out.astype(jnp.bfloat16)
    return x


def _ref_hybrid(params, res_x, res_aggs, user_x, user_aggs, pool_gather, hidden):
    r = _ref_gnn(res_x, res_aggs, params["res_gnn"])
    u = _ref_gnn(user_x, user_aggs, params["user_gnn"])
    pooled = _dot(_bf(pool_gather), u).astype(jnp.bfloat16)
    w1 = _bf(params["out_w"][:hidden])
    w2 = _bf(params["out_w"][hidden:])
    return _dot(r, w1) + _dot(pooled, w2) + params["out_b"]


# ------------------------------ main ------------------------------------------

if __name__ == "__main__":
    key = jax.random.PRNGKey(0)
    (k_res_feat, k_user_feat, k_e0, k_e1, k_e2, k_e3, k_inv,
     k_pr, k_pu, k_out) = jax.random.split(key, 10)

    # sizes
    res_size, user_size, hidden, output_size = 16, 8, 32, 4
    # NeighborSampler-style node counts (target prefix convention)
    RN0, RN1, RN2 = 12, 8, 4       # res graph: all sampled / hop-1 / final targets
    UN0, UN1, UN2 = 16, 10, 6      # user graph

    res_x = jax.random.normal(k_res_feat, (RN0, res_size), jnp.float32)
    user_x = jax.random.normal(k_user_feat, (UN0, user_size), jnp.float32)

    # edge_index per layer: row0 = src (into src node set), row1 = dst (into target prefix)
    res_e0 = jnp.stack([jax.random.randint(k_e0, (24,), 0, RN0),
                        jax.random.randint(jax.random.fold_in(k_e0, 1), (24,), 0, RN1)])
    res_e1 = jnp.stack([jax.random.randint(k_e1, (12,), 0, RN1),
                        jax.random.randint(jax.random.fold_in(k_e1, 1), (12,), 0, RN2)])
    usr_e0 = jnp.stack([jax.random.randint(k_e2, (30,), 0, UN0),
                        jax.random.randint(jax.random.fold_in(k_e2, 1), (30,), 0, UN1)])
    usr_e1 = jnp.stack([jax.random.randint(k_e3, (16,), 0, UN1),
                        jax.random.randint(jax.random.fold_in(k_e3, 1), (16,), 0, UN2)])

    res_aggs = [(build_mean_agg(res_e0, RN0, RN1), RN1),
                (build_mean_agg(res_e1, RN1, RN2), RN2)]
    user_aggs = [(build_mean_agg(usr_e0, UN0, UN1), UN1),
                 (build_mean_agg(usr_e1, UN1, UN2), UN2)]

    # per-res user membership (one empty group exercises the nan_to_num path -> zeros)
    num_users_per_res = [3, 2, 0, 4]
    inverse_idx = jax.random.randint(k_inv, (sum(num_users_per_res),), 0, UN2)
    pool_gather = build_pool_gather_matrix(num_users_per_res, inverse_idx, UN2)

    # parameters
    out_w, out_b = init_linear(k_out, 2 * hidden, output_size)
    params = {
        "res_gnn": init_gnn(k_pr, res_size, hidden),
        "user_gnn": init_gnn(k_pu, user_size, hidden),
        "out_w": out_w, "out_b": out_b,
    }

    # one-time packing (all casts / padding / weight stacking hoisted here)
    packed = jax.tree_util.tree_map(
        lambda a: jax.block_until_ready(a) if isinstance(a, jax.Array) else a,
        pack_hybrid(params, res_x, res_aggs, user_x, user_aggs, pool_gather,
                    res_size, user_size, hidden, output_size))

    out = hybrid_forward(packed)
    out = jax.block_until_ready(out)

    ref = _ref_hybrid(params, res_x, res_aggs, user_x, user_aggs, pool_gather, hidden)
    assert out.shape == (RN2, output_size), out.shape
    np.testing.assert_allclose(np.asarray(out), np.asarray(ref), rtol=1e-2, atol=1e-2)

    print("KERNEL_OK")
</pallas_src>

<mosaic_0001>
module attributes {stable_mosaic.version = 11 : i64} {
  func.func @_hybrid_fused_kernel(%arg0: memref<32x128xbf16, #tpu.memory_space<vmem>>, %arg1: memref<3x32x32xbf16, #tpu.memory_space<vmem>>, %arg2: memref<896x128xbf16, #tpu.memory_space<vmem>>, %arg3: memref<4x128xf32, #tpu.memory_space<vmem>>, %arg4: memref<32x128xf32, #tpu.memory_space<vmem>>) attributes {dimension_semantics = [], scalar_prefetch = 0 : i64, scratch_operands = 0 : i64, tpu.core_type = #tpu.core_type<tc>} {
    %c0 = arith.constant 0 : index
    %c0_0 = arith.constant 0 : index
    %0 = vector.load %arg3[%c0, %c0_0] : memref<4x128xf32, #tpu.memory_space<vmem>>, vector<4x128xf32>
    %c0_1 = arith.constant 0 : index
    %c0_2 = arith.constant 0 : index
    %1 = vector.load %arg0[%c0_1, %c0_2] : memref<32x128xbf16, #tpu.memory_space<vmem>>, vector<32x128xbf16>
    %c0_3 = arith.constant 0 : index
    %c0_4 = arith.constant 0 : index
    %2 = vector.load %arg2[%c0_3, %c0_4] : memref<896x128xbf16, #tpu.memory_space<vmem>>, vector<128x128xbf16>
    %cst = arith.constant dense<0.000000e+00> : vector<32x128xf32>
    %3 = tpu.matmul %1, %2, %cst {dimension_numbers = #tpu.dot_dimension_numbers<[1], [0], [0], [1], [0, 0, 1, 1], [], []>} : vector<32x128xbf16>, vector<128x128xbf16>, vector<32x128xf32> -> vector<32x128xf32>
    %4 = vector.extract_strided_slice %0 {offsets = [0, 0], sizes = [1, 128], strides = [1, 1]} : vector<4x128xf32> to vector<1x128xf32>
    %5 = vector.broadcast %4 : vector<1x128xf32> to vector<32x128xf32>
    %6 = arith.addf %3, %5 : vector<32x128xf32>
    %7 = arith.truncf %6 : vector<32x128xf32> to vector<32x128xbf16>
    %c0_5 = arith.constant 0 : index
    %c0_6 = arith.constant 0 : index
    %c0_7 = arith.constant 0 : index
    %8 = vector.load %arg1[%c0_5, %c0_6, %c0_7] : memref<3x32x32xbf16, #tpu.memory_space<vmem>>, vector<1x32x32xbf16>
    %9 = vector.shape_cast %8 : vector<1x32x32xbf16> to vector<32x32xbf16>
    %cst_8 = arith.constant dense<0.000000e+00> : vector<32x128xf32>
    %10 = tpu.matmul %9, %7, %cst_8 {dimension_numbers = #tpu.dot_dimension_numbers<[1], [0], [0], [1], [0, 0, 1, 1], [], []>} : vector<32x32xbf16>, vector<32x128xbf16>, vector<32x128xf32> -> vector<32x128xf32>
    %11 = arith.truncf %10 : vector<32x128xf32> to vector<32x128xbf16>
    %12 = tpu.concatenate %11, %7 in 1 : vector<32x128xbf16>, vector<32x128xbf16> -> vector<32x256xbf16>
    %c128 = arith.constant 128 : index
    %c0_9 = arith.constant 0 : index
    %13 = vector.load %arg2[%c128, %c0_9] : memref<896x128xbf16, #tpu.memory_space<vmem>>, vector<256x128xbf16>
    %cst_10 = arith.constant dense<0.000000e+00> : vector<32x128xf32>
    %14 = tpu.matmul %12, %13, %cst_10 {dimension_numbers = #tpu.dot_dimension_numbers<[1], [0], [0], [1], [0, 0, 1, 1], [], []>} : vector<32x256xbf16>, vector<256x128xbf16>, vector<32x128xf32> -> vector<32x128xf32>
    %15 = vector.extract_strided_slice %0 {offsets = [1, 0], sizes = [1, 128], strides = [1, 1]} : vector<4x128xf32> to vector<1x128xf32>
    %16 = vector.broadcast %15 : vector<1x128xf32> to vector<32x128xf32>
    %17 = arith.addf %14, %16 : vector<32x128xf32>
    %cst_11 = arith.constant 0.00999999977 : f32
    %18 = vector.broadcast %cst_11 : f32 to vector<32x128xf32>
    %19 = arith.mulf %18, %17 : vector<32x128xf32>
    %20 = arith.maximumf %17, %19 : vector<32x128xf32>
    %21 = arith.truncf %20 : vector<32x128xf32> to vector<32x128xbf16>
    %c1 = arith.constant 1 : index
    %c0_12 = arith.constant 0 : index
    %c0_13 = arith.constant 0 : index
    %22 = vector.load %arg1[%c1, %c0_12, %c0_13] : memref<3x32x32xbf16, #tpu.memory_space<vmem>>, vector<1x32x32xbf16>
    %23 = vector.shape_cast %22 : vector<1x32x32xbf16> to vector<32x32xbf16>
    %cst_14 = arith.constant dense<0.000000e+00> : vector<32x128xf32>
    %24 = tpu.matmul %23, %21, %cst_14 {dimension_numbers = #tpu.dot_dimension_numbers<[1], [0], [0], [1], [0, 0, 1, 1], [], []>} : vector<32x32xbf16>, vector<32x128xbf16>, vector<32x128xf32> -> vector<32x128xf32>
    %25 = arith.truncf %24 : vector<32x128xf32> to vector<32x128xbf16>
    %26 = tpu.concatenate %25, %21 in 1 : vector<32x128xbf16>, vector<32x128xbf16> -> vector<32x256xbf16>
    %c384 = arith.constant 384 : index
    %c0_15 = arith.constant 0 : index
    %27 = vector.load %arg2[%c384, %c0_15] : memref<896x128xbf16, #tpu.memory_space<vmem>>, vector<256x128xbf16>
    %cst_16 = arith.constant dense<0.000000e+00> : vector<32x128xf32>
    %28 = tpu.matmul %26, %27, %cst_16 {dimension_numbers = #tpu.dot_dimension_numbers<[1], [0], [0], [1], [0, 0, 1, 1], [], []>} : vector<32x256xbf16>, vector<256x128xbf16>, vector<32x128xf32> -> vector<32x128xf32>
    %29 = vector.extract_strided_slice %0 {offsets = [2, 0], sizes = [1, 128], strides = [1, 1]} : vector<4x128xf32> to vector<1x128xf32>
    %30 = vector.broadcast %29 : vector<1x128xf32> to vector<32x128xf32>
    %31 = arith.addf %28, %30 : vector<32x128xf32>
    %32 = arith.truncf %31 : vector<32x128xf32> to vector<32x128xbf16>
    %c2 = arith.constant 2 : index
    %c0_17 = arith.constant 0 : index
    %c0_18 = arith.constant 0 : index
    %33 = vector.load %arg1[%c2, %c0_17, %c0_18] : memref<3x32x32xbf16, #tpu.memory_space<vmem>>, vector<1x32x32xbf16>
    %34 = vector.shape_cast %33 : vector<1x32x32xbf16> to vector<32x32xbf16>
    %cst_19 = arith.constant dense<0.000000e+00> : vector<32x128xf32>
    %35 = tpu.matmul %34, %32, %cst_19 {dimension_numbers = #tpu.dot_dimension_numbers<[1], [0], [0], [1], [0, 0, 1, 1], [], []>} : vector<32x32xbf16>, vector<32x128xbf16>, vector<32x128xf32> -> vector<32x128xf32>
    %36 = arith.truncf %35 : vector<32x128xf32> to vector<32x128xbf16>
    %37 = tpu.concatenate %32, %36 in 1 : vector<32x128xbf16>, vector<32x128xbf16> -> vector<32x256xbf16>
    %c640 = arith.constant 640 : index
    %c0_20 = arith.constant 0 : index
    %38 = vector.load %arg2[%c640, %c0_20] : memref<896x128xbf16, #tpu.memory_space<vmem>>, vector<256x128xbf16>
    %cst_21 = arith.constant dense<0.000000e+00> : vector<32x128xf32>
    %39 = tpu.matmul %37, %38, %cst_21 {dimension_numbers = #tpu.dot_dimension_numbers<[1], [0], [0], [1], [0, 0, 1, 1], [], []>} : vector<32x256xbf16>, vector<256x128xbf16>, vector<32x128xf32> -> vector<32x128xf32>
    %40 = vector.extract_strided_slice %0 {offsets = [3, 0], sizes = [1, 128], strides = [1, 1]} : vector<4x128xf32> to vector<1x128xf32>
    %41 = vector.broadcast %40 : vector<1x128xf32> to vector<32x128xf32>
    %42 = arith.addf %39, %41 : vector<32x128xf32>
    %c0_22 = arith.constant 0 : index
    %c0_23 = arith.constant 0 : index
    %43 = vector.load %arg4[%c0_22, %c0_23] : memref<32x128xf32, #tpu.memory_space<vmem>>, vector<32x128xf32>
    tpu.vector_store %arg4[%c0_22, %c0_23], %42 {strides = array<i32>} : memref<32x128xf32, #tpu.memory_space<vmem>>, vector<32x128xf32>,
    return
  }
}

</mosaic_0001>

<bundles_post_ra>
// kernel: tpu_custom_call.1
= control target key start
LH: loop header
LB: loop body
LE: loop exit
PB: predicated region body
PF: predicated region fallthrough
CT: control target
= control target key end

     0   :  { %9 = vsyncpa [#allocation3], 0  ;;  %s1493_s0 = inlined_call_operand.hbm [shape: bf16[32,128], index: 0, kind: input, shape index: {}]   ;;  %s1494_s1 = inlined_call_operand.hbm [shape: bf16[3,32,32], index: 1, kind: input, shape index: {}]   ;;  %s1495_s2 = inlined_call_operand.hbm [shape: bf16[896,128], index: 2, kind: input, shape index: {}]   ;;  %s1496_s3 = inlined_call_operand.vmem [shape: f32[4,128], index: 3, kind: input, shape index: {}]   ;;  %s1497_s4 = inlined_call_operand.hbm [shape: f32[32,128], index: 4, kind: output, shape index: {}]  }
   0x1   :  { %10 = vsyncpa [#allocation6], 0 }
   0x2   :  { %11 = vsyncpa [#allocation4], 0  ;;  %s1375_s15 = smov [#allocation5]   ;;  %s1376_s17 = smov [#allocation2]  }
   0x3   :  { %s29_s16 = sshll.u32 %s1375_s15, 4  ;;  %s17_s18 = sshll.u32 %s1376_s17, 4  ;;  %s30_s16 = int_to_ptr.vmem [resolvable:$true] %s29_s16  ;;  %s1408_s18 = int_to_ptr.vmem [resolvable:$true] %s17_s18 }
   0x4   :  { %s1281_s21 = scalar_lea.hbm %s1494_s1, 768 }
   0x5   :  { %p1282_p0 = scmp.ne.s32.totalorder %s1494_s1, %s1281_s21  ;;  %p1285_p1 = scmp.lt.u32.totalorder %s1281_s21, %s1494_s1 }
   0x7   :  { %p1287_p2 = pnand %p1285_p1, %p1282_p0 }
   0x9   :  { %1290 = shalt.err (!%p1287_p2)
}
   0xa   :  { %s1291_s26 = scalar_lea.vmem %s30_s16, 768  ;;  %p1296_p4 = scmp.lt.s32.totalorder %s30_s16, %s30_s16 }
   0xb   :  { %p1292_p3 = scmp.ne.s32.totalorder %s30_s16, %s1291_s26  ;;  %p1297_p5 = scmp.lt.s32.totalorder %s1291_s26, %s1291_s26 }
   0xd   :  { %p1298_p6 = por %p1297_p5, %p1296_p4 }
   0xf   :  { %p1299_p7 = pnand %p1298_p6, %p1292_p3 }
  0x11   :  { %1302 = shalt.err (!%p1299_p7)
}
  0x12   :  { %s1377_s27 = smov 64   ;;  %s1378_s28 = smov 4  }
  0x13   :  { %35 = dma.hbm_to_vmem [thread:$0]  %s1494_s1, 768, %s30_s16, [#allocation6], %s1377_s27, %s1377_s27, %s1378_s28  }
  0x14   :  { %s1303_s7 = scalar_lea.hbm %s1493_s0, 256 }
  0x15   :  { %p1304_p8 = scmp.ne.s32.totalorder %s1493_s0, %s1303_s7  ;;  %p1307_p9 = scmp.lt.u32.totalorder %s1303_s7, %s1493_s0 }
  0x17   :  { %p1309_p10 = pnand %p1307_p9, %p1304_p8 }
  0x19   :  { %1312 = shalt.err (!%p1309_p10)
}
  0x1a   :  { %s1313_s12 = scalar_lea.vmem %s1408_s18, 256  ;;  %p1318_p12 = scmp.lt.s32.totalorder %s1408_s18, %s1408_s18 }
  0x1b   :  { %p1314_p11 = scmp.ne.s32.totalorder %s1408_s18, %s1313_s12  ;;  %p1319_p13 = scmp.lt.s32.totalorder %s1313_s12, %s1313_s12 }
  0x1d   :  { %p1320_p0 = por %p1319_p13, %p1318_p12 }
  0x1f   :  { %p1321_p1 = pnand %p1320_p0, %p1314_p11 }
  0x21   :  { %1324 = shalt.err (!%p1321_p1)
}
  0x22   :  { %23 = dma.hbm_to_vmem [thread:$0]  %s1493_s0, 256, %s1408_s18, [#allocation3], %s1377_s27, %s1377_s27, %s1378_s28  }
  0x23   :  { %s1379_s14 = smov [#allocation7]   ;;  %s1325_s19 = scalar_lea.hbm %s1495_s2, 7168 }
  0x24   :  { %s41_s15 = sshll.u32 %s1379_s14, 4  ;;  %p1326_p2 = scmp.ne.s32.totalorder %s1495_s2, %s1325_s19  ;;  %s42_s15 = int_to_ptr.vmem [resolvable:$true] %s41_s15 }
  0x25   :  { %p1329_p3 = scmp.lt.u32.totalorder %s1325_s19, %s1495_s2 }
  0x27   :  { %p1331_p4 = pnand %p1329_p3, %p1326_p2 }
  0x29   :  { %1334 = shalt.err (!%p1331_p4)
}
  0x2a   :  { %s1335_s24 = scalar_lea.vmem %s42_s15, 7168  ;;  %p1340_p6 = scmp.lt.s32.totalorder %s42_s15, %s42_s15 }
  0x2b   :  { %p1336_p5 = scmp.ne.s32.totalorder %s42_s15, %s1335_s24  ;;  %p1341_p7 = scmp.lt.s32.totalorder %s1335_s24, %s1335_s24 }
  0x2d   :  { %p1342_p8 = por %p1341_p7, %p1340_p6 }
  0x2f   :  { %p1343_p9 = pnand %p1342_p8, %p1336_p5 }
  0x31   :  { %1346 = shalt.err (!%p1343_p9)
}
  0x32   :  { %47 = dma.hbm_to_vmem [thread:$0]  %s1495_s2, 7168, %s42_s15, [#allocation6], %s1377_s27, %s1377_s27, %s1378_s28  }
  0x33   :  { %1369 = dma.done.wait [#allocation3], 256  }
  0x34   :  { %1370 = vsyncadd [#allocation3], 4294967040 }
  0x35   :  { %1371 = dma.done.wait [#allocation6], 7936  }
  0x36   :  { %1372 = vsyncadd [#allocation6], 4294959360  ;;  %v1217_v0 = vld [vmem:[#allocation7] sm:$0xff]   ;;  %v1218_v1 = vld [vmem:[#allocation7 + $0x8] sm:$0xff]   ;;  %vm210_vm0 = vcmask 261120   ;;  %v81_v25 = vlaneseq }
  0x37   :  { %1165 = vmatprep.subr.bf16.mxu0 %v1217_v0  ;;  %v1219_v2 = vld [vmem:[#allocation7 + $0x10] sm:$0xff]   ;;  %v1220_v3 = vld [vmem:[#allocation7 + $0x18] sm:$0xff]   ;;  %v1225_v4 = vld [vmem:[#allocation2] sm:$0xff]  }
  0x38   :  { %1166 = vmatpush3.bf16.msra.mxu0 %v1217_v0  ;;  %v1221_v5 = vld [vmem:[#allocation7 + $0x20] sm:$0xff]   ;;  %1181 = vmatprep.mubr.bf16.mxu0 %v1225_v4  ;;  %v1222_v6 = vld [vmem:[#allocation7 + $0x28] sm:$0xff]   ;;  %v1223_v7 = vld [vmem:[#allocation7 + $0x30] sm:$0xff]   ;;  %v1461_v26 = vshrl.u32 %v81_v25, 7 }
  0x39   :  { %1167 = vmatprep.subr.bf16.mxu0 %v1218_v1  ;;  %v1224_v8 = vld [vmem:[#allocation7 + $0x38] sm:$0xff]   ;;  %v1226_v9 = vld [vmem:[#allocation2 + $0x8] sm:$0xff]   ;;  %v1227_v10 = vld [vmem:[#allocation5] sm:$0xff]  }
  0x3a   :  { %v1229_v11 = vld [vmem:[#allocation7 + $0x80] sm:$0xff]   ;;  %v1231_v13 = vld [vmem:[#allocation7 + $0x88] sm:$0xff]   ;;  %v1233_v15 = vld [vmem:[#allocation7 + $0x90] sm:$0xff]   ;;  %v83_v27 = vsub.s32 0, %v1461_v26  ;;  %v302_v50 = vsub.s32 1, %v1461_v26 }
  0x3b   :  { %v1230_v12 = vld [vmem:[#allocation7 + $0x40] sm:$0xff]   ;;  %1073 = vmatprep.subr.bf16.mxu1 %v1229_v11  ;;  %v1232_v14 = vld [vmem:[#allocation7 + $0x48] sm:$0xff]   ;;  %v1234_v16 = vld [vmem:[#allocation7 + $0x50] sm:$0xff]  }
  0x3c   :  { %1168 = vmatpush3.bf16.msra.mxu0 %v1218_v1  ;;  %1074 = vmatpush3.bf16.msra.mxu1 %v1230_v12  ;;  %v1235_v17 = vld [vmem:[#allocation7 + $0x98] sm:$0xff]   ;;  %v1237_v19 = vld [vmem:[#allocation7 + $0xa0] sm:$0xff]   ;;  %v1239_v21 = vld [vmem:[#allocation7 + $0xa8] sm:$0xff]  }
  0x3d   :  { %1169 = vmatprep.subr.bf16.mxu0 %v1219_v2  ;;  %1075 = vmatprep.subr.bf16.mxu1 %v1231_v13  ;;  %v1236_v18 = vld [vmem:[#allocation7 + $0x58] sm:$0xff]   ;;  %v1238_v20 = vld [vmem:[#allocation7 + $0x60] sm:$0xff]   ;;  %v1240_v22 = vld [vmem:[#allocation7 + $0x68] sm:$0xff]  }
  0x3e   :  { %v1241_v23 = vld [vmem:[#allocation7 + $0xb0] sm:$0xff]   ;;  %v1467_v28 = vld [vmem:[%s1496_s3] sm:$0xf]  ;;  %v1228_v40 = vld [vmem:[#allocation5 + $0x8] sm:$0xff]   ;;  %s1380_s3 = smov [#allocation8]  }
  0x3f   :  { %v1242_v24 = vld [vmem:[#allocation7 + $0x70] sm:$0xff]   ;;  %v84_v29 = vrot.slane %v1467_v28, %v83_v27  ;;  %v1243_v41 = vld [vmem:[#allocation7 + $0xb8] sm:$0xff]   ;;  %v1245_v49 = vld [vmem:[#allocation5 + $0x10] sm:$0xff]   ;;  %v303_v52 = vrot.slane %v1467_v28, %v302_v50  ;;  %s976_s26 = sshll.u32 %s1380_s3, 4  ;;  %s977_s26 = int_to_ptr.vmem [resolvable:$true] %s976_s26 }
  0x40   :  { %1170 = vmatpush3.bf16.msra.mxu0 %v1219_v2  ;;  %1076 = vmatpush3.bf16.msra.mxu1 %v1232_v14  ;;  %v1244_v42 = vld [vmem:[#allocation7 + $0x78] sm:$0xff]   ;;  %v1247_v14 = vld [vmem:[#allocation7 + $0x100] sm:$0xff]   ;;  %v1257_v25 = vld [vmem:[#allocation7 + $0x128] sm:$0xff]   ;;  %s1347_s27 = scalar_lea.vmem %s977_s26, 512  ;;  %p1352_p11 = scmp.lt.s32.totalorder %s977_s26, %s977_s26 }
  0x41   :  { %1171 = vmatprep.subr.bf16.mxu0 %v1220_v3  ;;  %1077 = vmatprep.subr.bf16.mxu1 %v1233_v15  ;;  %v1246_v15 = vld [vmem:[#allocation5 + $0x18] sm:$0xff]   ;;  %p1348_p10 = scmp.ne.s32.totalorder %s977_s26, %s1347_s27  ;;  %p1353_p12 = scmp.lt.s32.totalorder %s1347_s27, %s1347_s27 }
  0x42   :  { %v1258_v27 = vld [vmem:[#allocation7 + $0xe8] sm:$0xff]  }
  0x43   :  { %p1354_p13 = por %p1353_p12, %p1352_p11 }
  0x44   :  { %1172 = vmatpush3.bf16.msra.mxu0 %v1220_v3  ;;  %1078 = vmatpush3.bf16.msra.mxu1 %v1234_v16  ;;  %v1248_v16 = vld [vmem:[#allocation7 + $0xc0] sm:$0xff]  }
  0x45   :  { %1173 = vmatprep.subr.bf16.mxu0 %v1221_v5  ;;  %1079 = vmatprep.subr.bf16.mxu1 %v1235_v17  ;;  %v1249_v17 = vld [vmem:[#allocation7 + $0x108] sm:$0xff]   ;;  %p1355_p0 = pnand %p1354_p13, %p1348_p10 }
  0x48   :  { %1174 = vmatpush3.bf16.msra.mxu0 %v1221_v5  ;;  %1080 = vmatpush3.bf16.msra.mxu1 %v1236_v18  ;;  %v1250_v18 = vld [vmem:[#allocation7 + $0xc8] sm:$0xff]  }
  0x49   :  { %1175 = vmatprep.subr.bf16.mxu0 %v1222_v6  ;;  %1081 = vmatprep.subr.bf16.mxu1 %v1237_v19  ;;  %v1251_v19 = vld [vmem:[#allocation7 + $0x110] sm:$0xff]  }
  0x4c   :  { %1176 = vmatpush3.bf16.msra.mxu0 %v1222_v6  ;;  %1082 = vmatpush3.bf16.msra.mxu1 %v1238_v20  ;;  %v1252_v20 = vld [vmem:[#allocation7 + $0xd0] sm:$0xff]  }
  0x4d   :  { %1177 = vmatprep.subr.bf16.mxu0 %v1223_v7  ;;  %1083 = vmatprep.subr.bf16.mxu1 %v1239_v21  ;;  %v1253_v21 = vld [vmem:[#allocation7 + $0x118] sm:$0xff]  }
  0x50   :  { %1178 = vmatpush3.bf16.msra.mxu0 %v1223_v7  ;;  %1084 = vmatpush3.bf16.msra.mxu1 %v1240_v22  ;;  %v1254_v22 = vld [vmem:[#allocation7 + $0xd8] sm:$0xff]  }
  0x51   :  { %1179 = vmatprep.subr.bf16.mxu0 %v1224_v8  ;;  %1085 = vmatprep.subr.bf16.mxu1 %v1241_v23  ;;  %v1255_v23 = vld [vmem:[#allocation7 + $0x120] sm:$0xff]  }
  0x54   :  { %1180 = vmatpush3.bf16.msra.mxu0 %v1224_v8  ;;  %1086 = vmatpush3.bf16.msra.mxu1 %v1242_v24  ;;  %v1256_v24 = vld [vmem:[#allocation7 + $0xe0] sm:$0xff]  }
  0x55   :  { %1087 = vmatprep.subr.bf16.mxu1 %v1243_v41 }
  0x57   :  { %1182 = vmatmul.mubr.bf16.vlgmr.msra.gmra.mrb[0].mxu0 %v1226_v9 }
  0x58   :  { %1189 = vmatprep.mubr.msk.bf16.mxu0 %vm210_vm0, %v1227_v10  ;;  %1088 = vmatpush3.bf16.msra.mxu1 %v1244_v42 }
 0x12a   :  { %v1183_v30 = vpop.f32.mrb[0].mxu0 }
 0x12b   :  { %v179_v31 = vpop.f32.mrb[1].mxu0  ;;  %v188_v33 = vadd.f32 %v1183_v30, %v84_v29  ;;  %v1260_v30 = vld [vmem:[#allocation7 + $0xf0] sm:$0xff]  }
 0x12c   :  { %v1184_v32 = vpop.f32.mrb[2].mxu0  ;;  %v180_v36 = vadd.f32 %v179_v31, %v84_v29  ;;  %v1261_v31 = vld [vmem:[#allocation7 + $0x138] sm:$0xff]  }
 0x12d   :  { %v191_v34 = vadd.f32 %v1184_v32, %v84_v29  ;;  %v182_v35 = vpop.f32.mrb[3].mxu0  ;;  %v1262_v32 = vld [vmem:[#allocation7 + $0xf8] sm:$0xff]  }
 0x12e   :  { %v183_v37 = vadd.f32 %v182_v35, %v84_v29  ;;  %v1259_v29 = vld [vmem:[#allocation7 + $0x130] sm:$0xff]  }
 0x12f   :  { %v195_v38 = vpack.c.bf16 %v191_v34, %v188_v33 }
 0x130   :  { %v194_v39 = vpack.c.bf16 %v183_v37, %v180_v36 }
 0x132   :  { %1185 = vmatprep.subr.bf16.mxu0 %v194_v39  ;;  %432 = vmatprep.mubr.bf16.mxu1 %v194_v39 }
 0x133   :  { %1186 = vmatpush3.bf16.msra.mxu0 %v194_v39  ;;  %v1263_v39 = vld [vmem:[#allocation5 + $0x20] sm:$0xff]  }
 0x134   :  { %1187 = vmatprep.subr.bf16.mxu0 %v195_v38 }
 0x137   :  { %1188 = vmatpush3.bf16.msra.mxu0 %v195_v38 }
 0x13a   :  { %1190 = vmatmul.mubr.msk.bf16.vlgmr.msra.gmra.mrb[4].mxu0 %vm210_vm0, %v1228_v40  ;;  %v565_v40 = vsub.s32 2, %v1461_v26 }
 0x13b   :  { %1197 = vmatprep.mubr.msk.bf16.mxu0 %vm210_vm0, %v1245_v49 }
 0x20d   :  { %v1191_v43 = vpop.f32.mrb[4].mxu0 }
 0x20e   :  { %v251_v44 = vpop.f32.mrb[5].mxu0 }
 0x20f   :  { %v1192_v45 = vpop.f32.mrb[6].mxu0 }
 0x210   :  { %v267_v46 = vpack.c.bf16 %v1192_v45, %v1191_v43  ;;  %v254_v47 = vpop.f32.mrb[7].mxu0  ;;  %v566_v43 = vrot.slane %v1467_v28, %v565_v40 }
 0x211   :  { %v266_v48 = vpack.c.bf16 %v254_v47, %v251_v44 }
 0x213   :  { %433 = vmatmul.mubr.bf16.vlgmr.msra.gmra.mrb[0].mxu1 %v266_v48 }
 0x214   :  { %440 = vmatprep.mubr.bf16.mxu1 %v195_v38 }
 0x21b   :  { %441 = vmatmul.mubr.bf16.gmra.mrb[4].mxu1 %v267_v46 }
 0x21c   :  { %1205 = vmatprep.mubr.msk.bf16.mxu1 %vm210_vm0, %v1263_v39 }
 0x2e6   :  { %v1089_v51 = vpop.f32.mrb[0].mxu1 }
 0x2e7   :  { %v1090_v53 = vpop.f32.mrb[1].mxu1 }
 0x2e8   :  { %v1091_v54 = vadd.f32 %v1090_v53, %v1089_v51  ;;  %v1092_v55 = vpop.f32.mrb[2].mxu1 }
 0x2e9   :  { %v1093_v56 = vpop.f32.mrb[3].mxu1 }
 0x2ea   :  { %v435_v57 = vadd.f32 %v1091_v54, %v303_v52  ;;  %v1094_v58 = vadd.f32 %v1093_v56, %v1092_v55 }
 0x2ec   :  { %v449_v59 = vmul.f32 0.01, %v435_v57  ;;  %v438_v60 = vadd.f32 %v1094_v58, %v303_v52 }
 0x2ee   :  { %v450_v61 = vmul.f32 0.01, %v438_v60  ;;  %v1095_v62 = vpop.f32.mrb[4].mxu1  ;;  %v453_v0 = vmax.f32 %v435_v57, %v449_v59 }
 0x2ef   :  { %v1096_v63 = vpop.f32.mrb[5].mxu1 }
 0x2f0   :  { %v454_v1 = vmax.f32 %v438_v60, %v450_v61  ;;  %v1097_v2 = vadd.f32 %v1096_v63, %v1095_v62  ;;  %v1098_v3 = vpop.f32.mrb[6].mxu1  ;;  %v1265_v60 = vld [vmem:[#allocation7 + $0x180] sm:$0xff]   ;;  %v1264_v61 = vld [vmem:[#allocation5 + $0x28] sm:$0xff]   ;;  %v1267_v63 = vld [vmem:[#allocation7 + $0x188] sm:$0xff]  }
 0x2f1   :  { %v1099_v4 = vpop.f32.mrb[7].mxu1  ;;  %v1266_v62 = vld [vmem:[#allocation7 + $0x140] sm:$0xff]  }
 0x2f2   :  { %v443_v5 = vadd.f32 %v1097_v2, %v303_v52  ;;  %v1100_v6 = vadd.f32 %v1099_v4, %v1098_v3  ;;  %v457_v7 = vpack.c.bf16 %v454_v1, %v453_v0  ;;  %v1268_v0 = vld [vmem:[#allocation7 + $0x148] sm:$0xff]   ;;  %v1269_v1 = vld [vmem:[#allocation7 + $0x190] sm:$0xff]   ;;  %v1271_v3 = vld [vmem:[#allocation7 + $0x198] sm:$0xff]  }
 0x2f3   :  { %v1270_v2 = vld [vmem:[#allocation7 + $0x150] sm:$0xff]   ;;  %v1272_v4 = vld [vmem:[#allocation7 + $0x158] sm:$0xff]  }
 0x2f4   :  { %v451_v8 = vmul.f32 0.01, %v443_v5  ;;  %v446_v9 = vadd.f32 %v1100_v6, %v303_v52  ;;  %1193 = vmatprep.subr.bf16.mxu0 %v457_v7  ;;  %v1274_v6 = vld [vmem:[#allocation7 + $0x160] sm:$0xff]  }
 0x2f5   :  { %1194 = vmatpush3.bf16.msra.mxu0 %v457_v7 }
 0x2f6   :  { %v452_v10 = vmul.f32 0.01, %v446_v9  ;;  %v455_v11 = vmax.f32 %v443_v5, %v451_v8  ;;  %v1273_v5 = vld [vmem:[#allocation7 + $0x1a0] sm:$0xff]   ;;  %v1276_v8 = vld [vmem:[#allocation7 + $0x168] sm:$0xff]  }
 0x2f8   :  { %v456_v12 = vmax.f32 %v446_v9, %v452_v10  ;;  %v1277_v9 = vld [vmem:[#allocation7 + $0x1b0] sm:$0xff]  }
 0x2f9   :  { %v1278_v10 = vld [vmem:[#allocation7 + $0x170] sm:$0xff]  }
 0x2fa   :  { %v458_v13 = vpack.c.bf16 %v456_v12, %v455_v11  ;;  %v1279_v11 = vld [vmem:[#allocation7 + $0x1b8] sm:$0xff]  }
 0x2fb   :  { %v1280_v12 = vld [vmem:[#allocation7 + $0x178] sm:$0xff]  }
 0x2fc   :  { %1195 = vmatprep.subr.bf16.mxu0 %v458_v13 }
 0x2fd   :  { %1196 = vmatpush3.bf16.msra.mxu0 %v458_v13 }
 0x2fe   :  { %1105 = vmatprep.subr.bf16.mxu0 %v1247_v14 }
 0x300   :  { %1198 = vmatmul.mubr.msk.bf16.vlgmr.msra.gmra.mrb[8].mxu0 %vm210_vm0, %v1246_v15 }
 0x301   :  { %695 = vmatprep.mubr.bf16.mxu0 %v457_v7  ;;  %1106 = vmatpush3.bf16.msra.mxu0 %v1248_v16  ;;  %v1275_v7 = vld [vmem:[#allocation7 + $0x1a8] sm:$0xff]  }
 0x302   :  { %1107 = vmatprep.subr.bf16.mxu0 %v1249_v17 }
 0x305   :  { %1108 = vmatpush3.bf16.msra.mxu0 %v1250_v18 }
 0x306   :  { %1109 = vmatprep.subr.bf16.mxu0 %v1251_v19  ;;  %v820_v19 = vsub.s32 3, %v1461_v26 }
 0x309   :  { %1110 = vmatpush3.bf16.msra.mxu0 %v1252_v20 }
 0x30a   :  { %1111 = vmatprep.subr.bf16.mxu0 %v1253_v21  ;;  %v821_v21 = vrot.slane %v1467_v28, %v820_v19 }
 0x30d   :  { %1112 = vmatpush3.bf16.msra.mxu0 %v1254_v22 }
 0x30e   :  { %1113 = vmatprep.subr.bf16.mxu0 %v1255_v23 }
 0x311   :  { %1114 = vmatpush3.bf16.msra.mxu0 %v1256_v24 }
 0x312   :  { %1115 = vmatprep.subr.bf16.mxu0 %v1257_v25 }
 0x315   :  { %1116 = vmatpush3.bf16.msra.mxu0 %v1258_v27 }
 0x316   :  { %1117 = vmatprep.subr.bf16.mxu0 %v1259_v29 }
 0x319   :  { %1118 = vmatpush3.bf16.msra.mxu0 %v1260_v30 }
 0x31a   :  { %1119 = vmatprep.subr.bf16.mxu0 %v1261_v31 }
 0x31d   :  { %1120 = vmatpush3.bf16.msra.mxu0 %v1262_v32 }
 0x3d3   :  { %v1199_v33 = vpop.f32.mrb[8].mxu0 }
 0x3d4   :  { %v514_v34 = vpop.f32.mrb[9].mxu0 }
 0x3d5   :  { %v1200_v35 = vpop.f32.mrb[10].mxu0 }
 0x3d6   :  { %v530_v36 = vpack.c.bf16 %v1200_v35, %v1199_v33  ;;  %v517_v37 = vpop.f32.mrb[11].mxu0 }
 0x3d7   :  { %v529_v38 = vpack.c.bf16 %v517_v37, %v514_v34 }
 0x3d9   :  { %696 = vmatmul.mubr.bf16.vlgmr.msra.gmra.mrb[12].mxu0 %v529_v38 }
 0x3da   :  { %703 = vmatprep.mubr.bf16.mxu0 %v458_v13 }
 0x3e1   :  { %704 = vmatmul.mubr.bf16.gmra.mrb[16].mxu0 %v530_v36 }
 0x4ac   :  { %v1121_v41 = vpop.f32.mrb[12].mxu0 }
 0x4ad   :  { %v1122_v42 = vpop.f32.mrb[13].mxu0 }
 0x4ae   :  { %v1123_v44 = vadd.f32 %v1122_v42, %v1121_v41  ;;  %v1124_v45 = vpop.f32.mrb[14].mxu0 }
 0x4af   :  { %v1125_v46 = vpop.f32.mrb[15].mxu0 }
 0x4b0   :  { %v1126_v47 = vadd.f32 %v1125_v46, %v1124_v45  ;;  %v698_v48 = vadd.f32 %v1123_v44, %v566_v43 }
 0x4b2   :  { %v701_v49 = vadd.f32 %v1126_v47, %v566_v43 }
 0x4b4   :  { %v1127_v50 = vpop.f32.mrb[16].mxu0  ;;  %v712_v51 = vpack.c.bf16 %v701_v49, %v698_v48 }
 0x4b5   :  { %v1128_v52 = vpop.f32.mrb[17].mxu0 }
 0x4b6   :  { %v1129_v53 = vadd.f32 %v1128_v52, %v1127_v50  ;;  %v1130_v54 = vpop.f32.mrb[18].mxu0  ;;  %1201 = vmatprep.subr.bf16.mxu1 %v712_v51 }
 0x4b7   :  { %v1131_v55 = vpop.f32.mrb[19].mxu0  ;;  %1202 = vmatpush3.bf16.msra.mxu1 %v712_v51 }
 0x4b8   :  { %v1132_v56 = vadd.f32 %v1131_v55, %v1130_v54  ;;  %v706_v57 = vadd.f32 %v1129_v53, %v566_v43 }
 0x4ba   :  { %v709_v58 = vadd.f32 %v1132_v56, %v566_v43 }
 0x4bc   :  { %v713_v59 = vpack.c.bf16 %v709_v58, %v706_v57 }
 0x4be   :  { %1203 = vmatprep.subr.bf16.mxu1 %v713_v59 }
 0x4bf   :  { %1204 = vmatpush3.bf16.msra.mxu1 %v713_v59 }
 0x4c0   :  { %1137 = vmatprep.subr.bf16.mxu1 %v1265_v60 }
 0x4c2   :  { %1206 = vmatmul.mubr.msk.bf16.vlgmr.msra.gmra.mrb[8].mxu1 %vm210_vm0, %v1264_v61 }
 0x4c3   :  { %1138 = vmatpush3.bf16.msra.mxu1 %v1266_v62 }
 0x4c4   :  { %1139 = vmatprep.subr.bf16.mxu1 %v1267_v63 }
 0x4c7   :  { %1140 = vmatpush3.bf16.msra.mxu1 %v1268_v0 }
 0x4c8   :  { %1141 = vmatprep.subr.bf16.mxu1 %v1269_v1 }
 0x4cb   :  { %1142 = vmatpush3.bf16.msra.mxu1 %v1270_v2 }
 0x4cc   :  { %1143 = vmatprep.subr.bf16.mxu1 %v1271_v3 }
 0x4cf   :  { %1144 = vmatpush3.bf16.msra.mxu1 %v1272_v4 }
 0x4d0   :  { %1145 = vmatprep.subr.bf16.mxu1 %v1273_v5 }
 0x4d3   :  { %1146 = vmatpush3.bf16.msra.mxu1 %v1274_v6 }
 0x4d4   :  { %1147 = vmatprep.subr.bf16.mxu1 %v1275_v7 }
 0x4d7   :  { %1148 = vmatpush3.bf16.msra.mxu1 %v1276_v8 }
 0x4d8   :  { %1149 = vmatprep.subr.bf16.mxu1 %v1277_v9 }
 0x4db   :  { %1150 = vmatpush3.bf16.msra.mxu1 %v1278_v10 }
 0x4dc   :  { %1151 = vmatprep.subr.bf16.mxu1 %v1279_v11 }
 0x4df   :  { %1152 = vmatpush3.bf16.msra.mxu1 %v1280_v12 }
 0x595   :  { %v1207_v13 = vpop.f32.mrb[8].mxu1 }
 0x596   :  { %v769_v14 = vpop.f32.mrb[9].mxu1 }
 0x597   :  { %v1208_v15 = vpop.f32.mrb[10].mxu1 }
 0x598   :  { %v785_v16 = vpack.c.bf16 %v1208_v15, %v1207_v13  ;;  %v772_v17 = vpop.f32.mrb[11].mxu1 }
 0x599   :  { %v784_v18 = vpack.c.bf16 %v772_v17, %v769_v14 }
 0x59b   :  { %950 = vmatprep.mubr.bf16.mxu1 %v784_v18 }
 0x59c   :  { %951 = vmatmul.mubr.bf16.vlgmr.msra.gmra.mrb[12].mxu1 %v712_v51 }
 0x59d   :  { %958 = vmatprep.mubr.bf16.mxu1 %v785_v16 }
 0x5a4   :  { %959 = vmatmul.mubr.bf16.gmra.mrb[16].mxu1 %v713_v59 }
 0x66f   :  { %v1153_v20 = vpop.f32.mrb[12].mxu1 }
 0x670   :  { %v1154_v22 = vpop.f32.mrb[13].mxu1 }
 0x671   :  { %v1155_v23 = vadd.f32 %v1154_v22, %v1153_v20  ;;  %v1156_v24 = vpop.f32.mrb[14].mxu1 }
 0x672   :  { %v1157_v25 = vpop.f32.mrb[15].mxu1 }
 0x673   :  { %v953_v27 = vadd.f32 %v1155_v23, %v821_v21  ;;  %v1158_v29 = vadd.f32 %v1157_v25, %v1156_v24 }
 0x675   :  { %967 = vst [vmem:[#allocation8] sm:$0xff] %v953_v27  ;;  %v956_v30 = vadd.f32 %v1158_v29, %v821_v21 }
 0x677   :  { %968 = vst [vmem:[#allocation8 + $0x8] sm:$0xff] %v956_v30  ;;  %v1159_v31 = vpop.f32.mrb[16].mxu1 }
 0x678   :  { %v1160_v32 = vpop.f32.mrb[17].mxu1 }
 0x679   :  { %v1161_v33 = vadd.f32 %v1160_v32, %v1159_v31  ;;  %v1162_v34 = vpop.f32.mrb[18].mxu1 }
 0x67a   :  { %v1163_v35 = vpop.f32.mrb[19].mxu1 }
 0x67b   :  { %v961_v26 = vadd.f32 %v1161_v33, %v821_v21  ;;  %v1164_v36 = vadd.f32 %v1163_v35, %v1162_v34 }
 0x67d   :  { %969 = vst [vmem:[#allocation8 + $0x10] sm:$0xff] %v961_v26  ;;  %v964_v28 = vadd.f32 %v1164_v36, %v821_v21 }
 0x67f   :  { %970 = vst [vmem:[#allocation8 + $0x18] sm:$0xff] %v964_v28 }
 0x680   :  { %1358 = shalt.err (!%p1355_p0)
}
 0x681   :  { %s1359_s30 = scalar_lea.hbm %s1497_s4, 512 }
 0x682   :  { %p1360_p1 = scmp.ne.s32.totalorder %s1497_s4, %s1359_s30  ;;  %p1363_p2 = scmp.lt.u32.totalorder %s1359_s30, %s1497_s4 }
 0x684   :  { %p1365_p3 = pnand %p1363_p2, %p1360_p1 }
 0x686   :  { %1368 = shalt.err (!%p1365_p3)
}
 0x687   :  { %s1381_s9 = smov 128   ;;  %s1382_s10 = smov 8  }
 0x688   :  { %982 = dma.vmem_to_hbm [thread:$0]  %s977_s26, 512, %s1497_s4, [#allocation4], %s1381_s9, %s1381_s9, %s1382_s10  }
 0x689   :  { %1373 = dma.done.wait [#allocation4], 512  }
 0x68a   :  { %1374 = vsyncadd [#allocation4], 4294966784 }
 0x68b   :  { %986 = vsyncpa [#allocation3], 1 }
 0x68c   :  { %987 = vsyncpa [#allocation6], 1 }
 0x68d   :  { %988 = vsyncpa [#allocation4], 1 }

</bundles_post_ra>
